<compile_context>
chip_gen: v7x
topology: tpu7x:2x2x1
jax: 0.10.0
libtpu: 0.0.40
codegen_flags: <defaults>
</compile_context>

<pallas_src>
import jax
import jax.numpy as jnp
from jax.experimental import pallas as pl
from jax.experimental.pallas import tpu as pltpu

_LANES = 128
_SUBLANES = 8
_MAX_TILE_ROWS = 512  # 512*128*4B = 256 KiB per buffer.


def _make_kernel(batch: int, tile_rows: int, tiles_per_split: int):
    def kernel(chosen_ref, reject_ref, acc_ref):
        s = pl.program_id(0)  # parallel split (megacore axis)
        t = pl.program_id(1)  # sequential reduction step within the split

        @pl.when(t == 0)
        def _():
            acc_ref[...] = jnp.zeros_like(acc_ref)

        c = chosen_ref[...].astype(jnp.float32)
        r = reject_ref[...].astype(jnp.float32)
        diff = c - r
        # -log(sigmoid(diff)) == softplus(-diff), numerically stable form.
        neg_log_sig = jnp.log1p(jnp.exp(-jnp.abs(diff))) - jnp.minimum(diff, 0.0)

        # Mask out zero-padded elements beyond the true batch size.
        row_ids = jax.lax.broadcasted_iota(jnp.int32, diff.shape, 0)
        lane_ids = jax.lax.broadcasted_iota(jnp.int32, diff.shape, 1)
        tile_global = s * tiles_per_split + t
        flat_idx = (tile_global * tile_rows + row_ids) * _LANES + lane_ids
        contrib = jnp.where(flat_idx < batch, neg_log_sig, 0.0)

        # Fold (tile_rows, 128) -> (8, 128): vreg-to-vreg adds only (no XLU,
        # no divide in the hot loop).  Reshape groups whole (8,128) vregs.
        acc_ref[...] += contrib.reshape(
            tile_rows // _SUBLANES, _SUBLANES, _LANES
        ).sum(axis=0)

    return kernel


def _tiling(batch: int):
    rows = pl.cdiv(batch, _LANES)
    rows = pl.cdiv(rows, _SUBLANES) * _SUBLANES          # sublane multiple
    tile_rows = min(_MAX_TILE_ROWS, rows)
    tiles = pl.cdiv(rows, tile_rows)
    splits = 2 if tiles >= 2 else 1                      # v7x: 2 TensorCores
    tiles_per_split = pl.cdiv(tiles, splits)
    padded_rows = splits * tiles_per_split * tile_rows
    return tile_rows, splits, tiles_per_split, padded_rows


def _to_tiles(x: jax.Array, padded_rows: int) -> jax.Array:
    flat = jnp.ravel(x)
    pad = padded_rows * _LANES - flat.shape[0]
    flat = jnp.pad(flat, (0, pad))
    return flat.reshape(padded_rows, _LANES)


def pairwise_loss(chosen_reward: jax.Array, reject_reward: jax.Array) -> jax.Array:
    """Computes -mean(log(sigmoid(chosen - reject))) as a scalar (f32)."""
    assert chosen_reward.shape == reject_reward.shape
    assert chosen_reward.ndim == 1
    batch = chosen_reward.shape[0]
    assert batch >= 1

    tile_rows, splits, tiles_per_split, padded_rows = _tiling(batch)

    chosen2d = _to_tiles(chosen_reward, padded_rows)
    reject2d = _to_tiles(reject_reward, padded_rows)

    in_map = lambda s, t: (s * tiles_per_split + t, 0)
    elt_bytes = chosen2d.dtype.itemsize

    partials = pl.pallas_call(
        _make_kernel(batch, tile_rows, tiles_per_split),
        out_shape=jax.ShapeDtypeStruct((splits, _SUBLANES, _LANES), jnp.float32),
        grid_spec=pltpu.PrefetchScalarGridSpec(
            num_scalar_prefetch=0,
            grid=(splits, tiles_per_split),
            in_specs=[
                pl.BlockSpec((tile_rows, _LANES), in_map),
                pl.BlockSpec((tile_rows, _LANES), in_map),
            ],
            out_specs=pl.BlockSpec((None, _SUBLANES, _LANES), lambda s, t: (s, 0, 0)),
        ),
        compiler_params=pltpu.CompilerParams(
            dimension_semantics=("parallel", "arbitrary"),
            vmem_limit_bytes=32 * 1024 * 1024,
        ),
        cost_estimate=pl.CostEstimate(
            flops=8 * batch,
            transcendentals=2 * batch,
            bytes_accessed=2 * padded_rows * _LANES * elt_bytes
            + splits * _SUBLANES * _LANES * 4,
        ),
    )(chosen2d, reject2d)

    # Tiny final reduce + scale by the true batch size (fused by XLA).
    return jnp.sum(partials) / batch


if __name__ == "__main__":
    key = jax.random.PRNGKey(0)
    k1, k2, k3, k4 = jax.random.split(key, 4)

    # Small demo consistent with the module: batch = 8.
    batch = 8
    chosen = jax.random.normal(k1, (batch,), dtype=jnp.float32)
    reject = jax.random.normal(k2, (batch,), dtype=jnp.float32)
    loss = pairwise_loss(chosen, reject)
    jax.block_until_ready(loss)
    ref = -jnp.mean(jnp.log(jax.nn.sigmoid(chosen - reject)))
    assert jnp.allclose(loss, ref, atol=1e-5, rtol=1e-5), (loss, ref)

    # Larger check: exercises multi-tile reduction, the 2-way parallel split
    # and the padded-lane masking (200_000 is not a multiple of the tile size).
    batch2 = 200_000
    chosen2 = jax.random.normal(k3, (batch2,), dtype=jnp.float32)
    reject2 = jax.random.normal(k4, (batch2,), dtype=jnp.float32)
    loss2 = pairwise_loss(chosen2, reject2)
    jax.block_until_ready(loss2)
    ref2 = -jnp.mean(jax.nn.log_sigmoid(chosen2 - reject2))
    assert jnp.allclose(loss2, ref2, atol=1e-5, rtol=1e-5), (loss2, ref2)

    print("KERNEL_OK")
</pallas_src>

<mosaic_0001>
module attributes {stable_mosaic.version = 11 : i64} {
  func.func @kernel(%arg0: i32, %arg1: i32, %arg2: memref<8x128xf32, #tpu.memory_space<vmem>>, %arg3: memref<8x128xf32, #tpu.memory_space<vmem>>, %arg4: memref<1x8x128xf32, #tpu.memory_space<vmem>>) attributes {dimension_semantics = [#tpu.dimension_semantics<parallel>, #tpu.dimension_semantics<arbitrary>], iteration_bounds = array<i64: 1, 1>, scalar_prefetch = 0 : i64, scratch_operands = 0 : i64, tpu.core_type = #tpu.core_type<tc>, window_params = [{transform_indices = @transform_0, window_bounds = array<i64: 8, 128>}, {transform_indices = @transform_1, window_bounds = array<i64: 8, 128>}, {transform_indices = @transform_2, window_bounds = array<i64: 1, 8, 128>}]} {
    %c0_i32 = arith.constant 0 : i32
    %0 = arith.cmpi eq, %arg1, %c0_i32 : i32
    %1 = arith.extui %0 : i1 to i32
    %c0_i32_0 = arith.constant 0 : i32
    %2 = arith.cmpi ne, %1, %c0_i32_0 : i32
    scf.if %2 {
      %cst_14 = arith.constant 0.000000e+00 : f32
      %36 = vector.broadcast %cst_14 : f32 to vector<8x128xf32>
      %c0_15 = arith.constant 0 : index
      %c0_16 = arith.constant 0 : index
      %c0_17 = arith.constant 0 : index
      %37 = vector.load %arg4[%c0_15, %c0_16, %c0_17] : memref<1x8x128xf32, #tpu.memory_space<vmem>>, vector<1x8x128xf32>
      %38 = vector.shape_cast %37 : vector<1x8x128xf32> to vector<8x128xf32>
      %39 = vector.shape_cast %36 : vector<8x128xf32> to vector<1x8x128xf32>
      tpu.vector_store %arg4[%c0_15, %c0_16, %c0_17], %39 {strides = array<i32>} : memref<1x8x128xf32, #tpu.memory_space<vmem>>, vector<1x8x128xf32>,
    } else {
    }
    %c0 = arith.constant 0 : index
    %c0_1 = arith.constant 0 : index
    %3 = vector.load %arg2[%c0, %c0_1] : memref<8x128xf32, #tpu.memory_space<vmem>>, vector<8x128xf32>
    %c0_2 = arith.constant 0 : index
    %c0_3 = arith.constant 0 : index
    %4 = vector.load %arg3[%c0_2, %c0_3] : memref<8x128xf32, #tpu.memory_space<vmem>>, vector<8x128xf32>
    %5 = arith.subf %3, %4 : vector<8x128xf32>
    %6 = math.absf %5 : vector<8x128xf32>
    %cst = arith.constant 0.000000e+00 : f32
    %7 = vector.broadcast %cst : f32 to vector<8x128xf32>
    %8 = arith.subf %7, %6 : vector<8x128xf32>
    %9 = math.exp %8 : vector<8x128xf32>
    %10 = math.log1p %9 : vector<8x128xf32>
    %cst_4 = arith.constant 0.000000e+00 : f32
    %11 = vector.broadcast %cst_4 : f32 to vector<8x128xf32>
    %12 = arith.minimumf %5, %11 : vector<8x128xf32>
    %13 = arith.subf %10, %12 : vector<8x128xf32>
    %14 = tpu.iota {dimensions = array<i32: 0>} : vector<8x128xi32>
    %15 = tpu.iota {dimensions = array<i32: 1>} : vector<8x128xi32>
    %c1_i32 = arith.constant 1 : i32
    %16 = arith.muli %arg0, %c1_i32 : i32
    %17 = arith.addi %16, %arg1 : i32
    %c8_i32 = arith.constant 8 : i32
    %18 = arith.muli %17, %c8_i32 : i32
    %19 = vector.broadcast %18 : i32 to vector<8x128xi32>
    %20 = arith.addi %19, %14 : vector<8x128xi32>
    %c128_i32 = arith.constant 128 : i32
    %21 = vector.broadcast %c128_i32 : i32 to vector<8x128xi32>
    %22 = arith.muli %20, %21 : vector<8x128xi32>
    %23 = arith.addi %22, %15 : vector<8x128xi32>
    %c8_i32_5 = arith.constant 8 : i32
    %24 = vector.broadcast %c8_i32_5 : i32 to vector<8x128xi32>
    %25 = arith.cmpi slt, %23, %24 : vector<8x128xi32>
    %cst_6 = arith.constant 0.000000e+00 : f32
    %26 = vector.broadcast %cst_6 : f32 to vector<8x128xf32>
    %27 = arith.select %25, %13, %26 : vector<8x128xi1>, vector<8x128xf32>
    %c0_7 = arith.constant 0 : index
    %c0_8 = arith.constant 0 : index
    %c0_9 = arith.constant 0 : index
    %28 = vector.load %arg4[%c0_7, %c0_8, %c0_9] : memref<1x8x128xf32, #tpu.memory_space<vmem>>, vector<1x8x128xf32>
    %29 = vector.shape_cast %28 : vector<1x8x128xf32> to vector<8x128xf32>
    %30 = vector.shape_cast %27 : vector<8x128xf32> to vector<1x8x128xf32>
    %cst_10 = arith.constant dense<0.000000e+00> : vector<8x128xf32>
    %31 = vector.multi_reduction <add>, %30, %cst_10 [0] : vector<1x8x128xf32> to vector<8x128xf32>
    %32 = arith.addf %29, %31 : vector<8x128xf32>
    %c0_11 = arith.constant 0 : index
    %c0_12 = arith.constant 0 : index
    %c0_13 = arith.constant 0 : index
    %33 = vector.load %arg4[%c0_11, %c0_12, %c0_13] : memref<1x8x128xf32, #tpu.memory_space<vmem>>, vector<1x8x128xf32>
    %34 = vector.shape_cast %33 : vector<1x8x128xf32> to vector<8x128xf32>
    %35 = vector.shape_cast %32 : vector<8x128xf32> to vector<1x8x128xf32>
    tpu.vector_store %arg4[%c0_11, %c0_12, %c0_13], %35 {strides = array<i32>} : memref<1x8x128xf32, #tpu.memory_space<vmem>>, vector<1x8x128xf32>,
    return
  }
  func.func @transform_0(%arg0: i32, %arg1: i32) -> (i32, i32) {
    %c1_i32 = arith.constant 1 : i32
    %0 = arith.muli %arg0, %c1_i32 : i32
    %1 = arith.addi %0, %arg1 : i32
    %c0_i32 = arith.constant 0 : i32
    %c0_i32_0 = arith.constant 0 : i32
    return %1, %c0_i32 : i32, i32
  }
  func.func @transform_1(%arg0: i32, %arg1: i32) -> (i32, i32) {
    %c1_i32 = arith.constant 1 : i32
    %0 = arith.muli %arg0, %c1_i32 : i32
    %1 = arith.addi %0, %arg1 : i32
    %c0_i32 = arith.constant 0 : i32
    %c0_i32_0 = arith.constant 0 : i32
    return %1, %c0_i32 : i32, i32
  }
  func.func @transform_2(%arg0: i32, %arg1: i32) -> (i32, i32, i32) {
    %c0_i32 = arith.constant 0 : i32
    %c0_i32_0 = arith.constant 0 : i32
    %c0_i32_1 = arith.constant 0 : i32
    return %arg0, %c0_i32, %c0_i32_0 : i32, i32, i32
  }
}

</mosaic_0001>

<bundles_post_ra>
// kernel: tpu_custom_call.1
= control target key start
LH: loop header
LB: loop body
LE: loop exit
PB: predicated region body
PF: predicated region fallthrough
CT: control target
= control target key end

     0   :  { %7 = vsyncpa [#allocation3], 0  ;;  %s233_s0 = inlined_call_operand.hbm [shape: f32[8,128], index: 0, kind: input, shape index: {}]   ;;  %s234_s1 = inlined_call_operand.hbm [shape: f32[8,128], index: 1, kind: input, shape index: {}]   ;;  %s235_s2 = inlined_call_operand.hbm [shape: f32[1,8,128], index: 2, kind: output, shape index: {}]  }
   0x1   :  { %8 = vsyncpa [#allocation6], 0 }
   0x2   :  { %9 = vsyncpa [#allocation4], 0  ;;  %s179_s9 = smov [#allocation2]   ;;  %s180_s11 = smov [#allocation5]  }
   0x3   :  { %s19_s10 = sshll.u32 %s179_s9, 4  ;;  %s32_s12 = sshll.u32 %s180_s11, 4  ;;  %s20_s10 = int_to_ptr.vmem [resolvable:$true] %s19_s10  ;;  %s33_s12 = int_to_ptr.vmem [resolvable:$true] %s32_s12 }
   0x4   :  { %s107_s15 = scalar_lea.hbm %s233_s0, 128 }
   0x5   :  { %p108_p0 = scmp.ne.s32.totalorder %s233_s0, %s107_s15  ;;  %p111_p1 = scmp.lt.u32.totalorder %s107_s15, %s233_s0 }
   0x7   :  { %p113_p2 = pnand %p111_p1, %p108_p0 }
   0x9   :  { %116 = shalt.err (!%p113_p2)
}
   0xa   :  { %s117_s20 = scalar_lea.vmem %s20_s10, 128  ;;  %p122_p4 = scmp.lt.s32.totalorder %s20_s10, %s20_s10 }
   0xb   :  { %p118_p3 = scmp.ne.s32.totalorder %s20_s10, %s117_s20  ;;  %p123_p5 = scmp.lt.s32.totalorder %s117_s20, %s117_s20 }
   0xd   :  { %p124_p6 = por %p123_p5, %p122_p4 }
   0xf   :  { %p125_p7 = pnand %p124_p6, %p118_p3 }
  0x11   :  { %128 = shalt.err (!%p125_p7)
}
  0x12   :  { %22 = dma.hbm_to_vmem [thread:$0]  %s233_s0, 128, %s20_s10, [#allocation3]  }
  0x13   :  { %s129_s25 = scalar_lea.hbm %s234_s1, 128 }
  0x14   :  { %p130_p8 = scmp.ne.s32.totalorder %s234_s1, %s129_s25  ;;  %p133_p9 = scmp.lt.u32.totalorder %s129_s25, %s234_s1 }
  0x16   :  { %p135_p10 = pnand %p133_p9, %p130_p8 }
  0x18   :  { %138 = shalt.err (!%p135_p10)
}
  0x19   :  { %s139_s30 = scalar_lea.vmem %s33_s12, 128  ;;  %p144_p12 = scmp.lt.s32.totalorder %s33_s12, %s33_s12 }
  0x1a   :  { %p140_p11 = scmp.ne.s32.totalorder %s33_s12, %s139_s30  ;;  %p145_p13 = scmp.lt.s32.totalorder %s139_s30, %s139_s30 }
  0x1c   :  { %p146_p0 = por %p145_p13, %p144_p12 }
  0x1e   :  { %p147_p1 = pnand %p146_p0, %p140_p11 }
  0x20   :  { %150 = shalt.err (!%p147_p1)
}
  0x21   :  { %35 = dma.hbm_to_vmem [thread:$0]  %s234_s1, 128, %s33_s12, [#allocation6]  }
  0x22   :  { %173 = dma.done.wait [#allocation3], 128  }
  0x23   :  { %174 = vsyncadd [#allocation3], 4294967168 }
  0x24   :  { %175 = dma.done.wait [#allocation6], 128  }
  0x25   :  { %176 = vsyncadd [#allocation6], 4294967168  ;;  %v49_v0 = vld [vmem:[#allocation2] sm:$0xff]  ;;  %v50_v1 = vld [vmem:[#allocation5] sm:$0xff]  ;;  %v67_v7 = vlaneseq  ;;  %s181_s1 = smov [#allocation7]  }
  0x26   :  { %v51_v2 = vsub.f32 %v49_v0, %v50_v1  ;;  %s89_s4 = sshll.u32 %s181_s1, 4  ;;  %s90_s4 = int_to_ptr.vmem [resolvable:$true] %s89_s4 }
  0x27   :  { %v68_v10 = vshrl.u32 %v67_v7, 7  ;;  %v70_v12 = vand.u32 127, %v67_v7  ;;  %s151_s5 = scalar_lea.vmem %s90_s4, 128  ;;  %p156_p3 = scmp.lt.s32.totalorder %s90_s4, %s90_s4 }
  0x28   :  { %v52_v3 = vand.u32 2147483647, %v51_v2  ;;  %v65_v18 = vmin.f32 %v51_v2, 0.0  ;;  %p152_p2 = scmp.ne.s32.totalorder %s90_s4, %s151_s5  ;;  %p157_p4 = scmp.lt.s32.totalorder %s151_s5, %s151_s5 }
  0x29   :  { %v75_v13 = vmul.u32 128, %v68_v10 }
  0x2a   :  { %v53_v4 = vsub.f32 0.0, %v52_v3  ;;  %p158_p5 = por %p157_p4, %p156_p3 }
  0x2b   :  { %v76_v16 = vadd.s32 %v75_v13, %v70_v12 }
  0x2c   :  { %v54_v5 = vmul.f32 1.442695, %v53_v4  ;;  %p159_p6 = pnand %p158_p5, %p152_p2 }
  0x2d   :  { %vm77_vm1 = vcmp.lt.s32.totalorder %v76_v16, 8 }
  0x2e   :  { %103 = vpow2.f32 %v54_v5 }
  0x38   :  { %v104_v6 = vpop.eup %103 }
  0x39   :  { %v56_v8 = vadd.f32 1.0, %v104_v6  ;;  %v59_v9 = vmul.f32 -0.5, %v104_v6  ;;  %v62_v14 = vand.u32 2147483647, %v104_v6 }
  0x3b   :  { %105 = vlog2.f32 %v56_v8  ;;  %v60_v11 = vadd.f32 1.0, %v59_v9  ;;  %vm63_vm0 = vcmp.lt.f32.partialorder %v62_v14, 0.0004427343 }
  0x3d   :  { %v61_v15 = vmul.f32 %v104_v6, %v60_v11 }
  0x45   :  { %v106_v17 = vpop.eup %105 }
  0x46   :  { %v58_v19 = vmul.f32 0.6931472, %v106_v17 }
  0x48   :  { %v64_v20 = vsel %vm63_vm0, %v61_v15, %v58_v19 }
  0x49   :  { %v66_v21 = vsub.f32 %v64_v20, %v65_v18 }
  0x4b   :  { %v78_v22 = vsel %vm77_vm1, %v66_v21, 0.0 }
  0x4c   :  { %82 = vst [vmem:[#allocation7] sm:$0xff] %v78_v22 }
  0x4d   :  { %162 = shalt.err (!%p159_p6)
}
  0x4e   :  { %s163_s8 = scalar_lea.hbm %s235_s2, 128 }
  0x4f   :  { %p164_p7 = scmp.ne.s32.totalorder %s235_s2, %s163_s8  ;;  %p167_p8 = scmp.lt.u32.totalorder %s163_s8, %s235_s2 }
  0x51   :  { %p169_p9 = pnand %p167_p8, %p164_p7 }
  0x53   :  { %172 = shalt.err (!%p169_p9)
}
  0x54   :  { %92 = dma.vmem_to_hbm [thread:$0]  %s90_s4, 128, %s235_s2, [#allocation4]  }
  0x55   :  { %177 = dma.done.wait [#allocation4], 128  }
  0x56   :  { %178 = vsyncadd [#allocation4], 4294967168 }
  0x57   :  { %96 = vsyncpa [#allocation3], 1 }
  0x58   :  { %97 = vsyncpa [#allocation6], 1 }
  0x59   :  { %98 = vsyncpa [#allocation4], 1 }

</bundles_post_ra>
